<compile_context>
chip_gen: v7x
topology: tpu7x:2x2x1
jax: 0.10.0
libtpu: 0.0.40
codegen_flags: <defaults>
</compile_context>

<pallas_src>
import jax
import jax.numpy as jnp
from jax.experimental import pallas as pl
from jax.experimental.pallas import tpu as pltpu


def _hybrid_conv_kernel(cov_ref, patches_ref, w01_ref, out_ref):
    # cov_ref:     SMEM (B,)              per-sample scalar modulation
    # patches_ref: VMEM (1, K, TP)        im2col patches tile (lane dim = pixels)
    # w01_ref:     VMEM (2*Cout, K)       stacked [W0; W1], batch-invariant
    # out_ref:     VMEM (1, Cout, TP)
    i = pl.program_id(0)
    c = cov_ref[i]
    cout = out_ref.shape[1]
    # Single MXU matmul producing both the W0 and W1 partial results.
    acc = jnp.dot(w01_ref[...], patches_ref[0],
                  preferred_element_type=jnp.float32)        # (2*Cout, TP)
    # out = W0 @ p + cov[i] * (W1 @ p)   (VPU combine, f32, vreg-aligned split)
    out_ref[0] = (acc[:cout] + c * acc[cout:]).astype(out_ref.dtype)


def hybrid_conv2d(x, cov, W0, W1, stride=1, padding=0):
    """x: (B, Cin, H, W) f32; cov: (B,) f32; W0/W1: (Cout, Cin, KH, KW) f32."""
    B, Cin, H, W = x.shape
    Cout, _, KH, KW = W0.shape
    OH = (H + 2 * padding - KH) // stride + 1
    OW = (W + 2 * padding - KW) // stride + 1
    P = OH * OW
    K = Cin * KH * KW

    # ---- im2col (glue, plain JAX) producing (B, K, P) directly — no transpose.
    # Feature order (Cin, KH, KW) row-major matches W.reshape(Cout, Cin*KH*KW).
    xp = jnp.pad(x, ((0, 0), (0, 0), (padding, padding), (padding, padding)))
    cols = []
    for kh in range(KH):
        for kw in range(KW):
            cols.append(xp[:, :, kh:kh + stride * OH:stride,
                               kw:kw + stride * OW:stride])
    patches = jnp.stack(cols, axis=2).reshape(B, K, P)        # (B, K, P)

    # ---- Adaptive pixel tiling: biggest multiple-of-128 tile whose
    # double-buffered in/out slabs stay inside a conservative VMEM budget.
    vmem_budget = 24 * 1024 * 1024                      # leave headroom in 32 MiB
    bytes_per_col = 4 * 2 * (K + Cout)                  # f32, in+out, x2 buffers
    tp_cap = max(128, (vmem_budget // bytes_per_col) // 128 * 128)
    P128 = pl.cdiv(P, 128) * 128
    TP = min(P128, 2048, tp_cap)
    P_pad = pl.cdiv(P, TP) * TP
    if P_pad != P:
        patches = jnp.pad(patches, ((0, 0), (0, 0), (0, P_pad - P)))

    # Stacked weights [W0; W1] -> (2*Cout, K), resident across the whole grid.
    w01 = jnp.concatenate([W0.reshape(Cout, K), W1.reshape(Cout, K)], axis=0)

    cost = pl.CostEstimate(
        flops=2 * B * (2 * Cout) * K * P_pad,
        transcendentals=0,
        bytes_accessed=4 * (B * K * P_pad + 2 * Cout * K + B * Cout * P_pad),
    )

    out = pl.pallas_call(
        _hybrid_conv_kernel,
        out_shape=jax.ShapeDtypeStruct((B, Cout, P_pad), x.dtype),
        grid_spec=pltpu.PrefetchScalarGridSpec(
            num_scalar_prefetch=0,
            grid=(B, P_pad // TP),
            in_specs=[
                pl.BlockSpec(memory_space=pltpu.MemorySpace.SMEM),      # cov
                pl.BlockSpec((1, K, TP), lambda i, j: (i, 0, j)),       # patches
                pl.BlockSpec((2 * Cout, K), lambda i, j: (0, 0)),       # [W0;W1]
            ],
            out_specs=pl.BlockSpec((1, Cout, TP), lambda i, j: (i, 0, j)),
        ),
        compiler_params=pltpu.CompilerParams(
            dimension_semantics=("parallel", "parallel"),
            vmem_limit_bytes=32 * 1024 * 1024),
        cost_estimate=cost,
    )(cov, patches, w01)

    # (B, Cout, P_pad) -> crop padding -> (B, Cout, OH, OW); no transpose needed.
    return out[:, :, :P].reshape(B, Cout, OH, OW)


if __name__ == "__main__":
    key = jax.random.PRNGKey(0)
    B, Cin, Cout, H, W, KH, KW = 2, 4, 8, 16, 16, 3, 3
    stride, padding = 1, 1

    k_w0, k_w1, k_x, k_cov = jax.random.split(key, 4)
    # kaiming_normal_, mode='fan_out', nonlinearity='relu':
    #   std = sqrt(2 / fan_out), fan_out = Cout * KH * KW
    std = (2.0 / (Cout * KH * KW)) ** 0.5
    W0 = jax.random.normal(k_w0, (Cout, Cin, KH, KW), jnp.float32) * std
    W1 = jax.random.normal(k_w1, (Cout, Cin, KH, KW), jnp.float32) * std
    x = jax.random.normal(k_x, (B, Cin, H, W), jnp.float32)
    cov = jax.random.normal(k_cov, (B,), jnp.float32)  # per-sample scalar cov

    out = hybrid_conv2d(x, cov, W0, W1, stride=stride, padding=padding)
    out = jax.block_until_ready(out)

    # Reference: per-sample conv with modulated kernel (matches the torch loop).
    refs = []
    for i in range(B):
        kern = W0 + W1 * cov[i]
        refs.append(jax.lax.conv_general_dilated(
            x[i:i + 1], kern, (stride, stride),
            [(padding, padding), (padding, padding)],
            dimension_numbers=("NCHW", "OIHW", "NCHW")))
    ref = jnp.concatenate(refs, axis=0)

    assert out.shape == (B, Cout, H, W)
    assert jnp.allclose(out, ref, atol=1e-4, rtol=1e-4), \
        float(jnp.max(jnp.abs(out - ref)))
    print("KERNEL_OK")
</pallas_src>

<mosaic_0001>
module attributes {stable_mosaic.version = 11 : i64} {
  func.func @_hybrid_conv_kernel(%arg0: i32, %arg1: i32, %arg2: memref<2xf32, #tpu.memory_space<smem>>, %arg3: memref<1x36x256xf32, #tpu.memory_space<vmem>>, %arg4: memref<16x36xf32, #tpu.memory_space<vmem>>, %arg5: memref<1x8x256xf32, #tpu.memory_space<vmem>>) attributes {dimension_semantics = [#tpu.dimension_semantics<parallel>, #tpu.dimension_semantics<parallel>], iteration_bounds = array<i64: 2, 1>, scalar_prefetch = 0 : i64, scratch_operands = 0 : i64, tpu.core_type = #tpu.core_type<tc>, window_params = [{transform_indices = @transform_0, window_bounds = array<i64: 2>}, {transform_indices = @transform_1, window_bounds = array<i64: 1, 36, 256>}, {pipeline_mode = #tpu.pipeline_mode<synchronous>, transform_indices = @transform_2, window_bounds = array<i64: 16, 36>}, {transform_indices = @transform_3, window_bounds = array<i64: 1, 8, 256>}]} {
    %0 = arith.index_cast %arg0 : i32 to index
    %1 = memref.load %arg2[%0] : memref<2xf32, #tpu.memory_space<smem>>
    %c0 = arith.constant 0 : index
    %c0_0 = arith.constant 0 : index
    %2 = vector.load %arg4[%c0, %c0_0] : memref<16x36xf32, #tpu.memory_space<vmem>>, vector<16x36xf32>
    %c0_1 = arith.constant 0 : index
    %c0_2 = arith.constant 0 : index
    %c0_3 = arith.constant 0 : index
    %3 = vector.load %arg3[%c0_1, %c0_2, %c0_3] : memref<1x36x256xf32, #tpu.memory_space<vmem>>, vector<1x36x256xf32>
    %4 = vector.shape_cast %3 : vector<1x36x256xf32> to vector<36x256xf32>
    %cst = arith.constant dense<0.000000e+00> : vector<16x256xf32>
    %5 = tpu.matmul %2, %4, %cst {dimension_numbers = #tpu.dot_dimension_numbers<[1], [0], [0], [1], [0, 0, 1, 1], [], []>} : vector<16x36xf32>, vector<36x256xf32>, vector<16x256xf32> -> vector<16x256xf32>
    %6 = vector.extract_strided_slice %5 {offsets = [0, 0], sizes = [8, 256], strides = [1, 1]} : vector<16x256xf32> to vector<8x256xf32>
    %7 = vector.extract_strided_slice %5 {offsets = [8, 0], sizes = [8, 256], strides = [1, 1]} : vector<16x256xf32> to vector<8x256xf32>
    %8 = vector.broadcast %1 : f32 to vector<8x256xf32>
    %9 = arith.mulf %8, %7 : vector<8x256xf32>
    %10 = arith.addf %6, %9 : vector<8x256xf32>
    %c0_4 = arith.constant 0 : index
    %c0_5 = arith.constant 0 : index
    %c0_6 = arith.constant 0 : index
    %11 = vector.load %arg5[%c0_4, %c0_5, %c0_6] : memref<1x8x256xf32, #tpu.memory_space<vmem>>, vector<1x8x256xf32>
    %12 = vector.shape_cast %11 : vector<1x8x256xf32> to vector<8x256xf32>
    %13 = vector.shape_cast %10 : vector<8x256xf32> to vector<1x8x256xf32>
    tpu.vector_store %arg5[%c0_4, %c0_5, %c0_6], %13 {strides = array<i32>} : memref<1x8x256xf32, #tpu.memory_space<vmem>>, vector<1x8x256xf32>,
    return
  }
  func.func @transform_0(%arg0: i32, %arg1: i32) -> i32 {
    %c0_i32 = arith.constant 0 : i32
    %c0_i32_0 = arith.constant 0 : i32
    return %c0_i32 : i32
  }
  func.func @transform_1(%arg0: i32, %arg1: i32) -> (i32, i32, i32) {
    %c0_i32 = arith.constant 0 : i32
    %c0_i32_0 = arith.constant 0 : i32
    return %arg0, %c0_i32, %arg1 : i32, i32, i32
  }
  func.func @transform_2(%arg0: i32, %arg1: i32) -> (i32, i32) {
    %c0_i32 = arith.constant 0 : i32
    %c0_i32_0 = arith.constant 0 : i32
    %c0_i32_1 = arith.constant 0 : i32
    return %c0_i32, %c0_i32_0 : i32, i32
  }
  func.func @transform_3(%arg0: i32, %arg1: i32) -> (i32, i32, i32) {
    %c0_i32 = arith.constant 0 : i32
    %c0_i32_0 = arith.constant 0 : i32
    return %arg0, %c0_i32, %arg1 : i32, i32, i32
  }
}

</mosaic_0001>

<bundles_post_ra>
// kernel: tpu_custom_call.1
= control target key start
LH: loop header
LB: loop body
LE: loop exit
PB: predicated region body
PF: predicated region fallthrough
CT: control target
= control target key end

     0   :  { %8 = vsyncpa [#allocation4], 0  ;;  %s793_s0 = inlined_call_operand.vmem [shape: f32[2], index: 0, kind: input, shape index: {}]   ;;  %s794_s1 = inlined_call_operand.vmem [shape: f32[2,36,256], index: 1, kind: input, shape index: {}]   ;;  %s795_s2 = inlined_call_operand.vmem [shape: f32[16,36], index: 2, kind: input, shape index: {}]   ;;  %s796_s3 = inlined_call_operand.hbm [shape: f32[2,8,256], index: 3, kind: output, shape index: {}]  }
   0x1   :  { %9 = vsyncpa [#allocation3], 0 }
   0x2   :  { %11 = vsyncpa [#allocation3 + $0x1], 0  ;;  %s653_s12 = smov 0   ;;  %s655_s13 = smov 0  }
   0x3   :  { %s657_s14 = smov 0   ;;  %s659_s15 = smov 0  }
   0x4   :  { %s661_s16 = smov 0   ;;  %s663_s17 = smov 0  }
   0x5 LB: > { %s430_s18 = sadd.s32 4294967295, %s628_s17   ;;  %s431_s19 = sadd.s32 4294967294, %s628_s17   ;;  %s628_s17 = sphi %s663_s17, %s17_s17   ;;  %s624_s16 = sphi %s661_s16, %s805_s16   ;;  %s620_s15 = sphi %s659_s15, %s804_s15   ;;  %s616_s14 = sphi %s657_s14, %s803_s14   ;;  %s612_s13 = sphi %s655_s13, %s802_s13   ;;  %s608_s12 = sphi %s653_s12, %s801_s12  }
   0x6   : > { %s29_s20 = sadd.s32 1, %s624_s16  ;;  %s108_s21 = sadd.s32 1, %s616_s14 }
   0x7   : > { %p31_p0 = scmp.ge.s32.totalorder %s29_s20, 2  ;;  %p118_p1 = scmp.ne.s32.totalorder %s616_s14, %s612_s13 }
   0x8   : > { %p119_p2 = scmp.eq.s32.totalorder %s430_s18, 1  ;;  %p124_p3 = scmp.ne.s32.totalorder %s612_s13, %s608_s12 }
   0x9   : > { %s807_s20 = smov (%p31_p0, %s29_s20), 0  ;;  %p125_p5 = scmp.eq.s32.totalorder %s431_s19, 1 }
   0xa   : > { %p693_p4 = por %p119_p2, %p118_p1  ;;  %s103_s23 = ssub.s32 %s624_s16, %s807_s20 }
   0xb   : > { %p432_p6 = scmp.ge.s32.totalorder %s628_s17, 1  ;;  %p106_p7 = scmp.eq.s32.totalorder %s103_s23, 0 }
   0xc   : > { %p700_p8 = por %p125_p5, %p124_p3  ;;  %p132_p9 = scmp.lt.s32.totalorder %s628_s17, 3 }
   0xd   : > { %s706_s25 = scalar_select %p106_p7, %s616_s14, %s108_s21  }
   0xe   : > { %p708_p10 = pnand %p432_p6, %p132_p9  ;;  %p712_p11 = scmp.eq.s32.totalorder %s430_s18, 0 }
   0xf   : > { %s145_s30 = sshll.u32 %s793_s0, 4  ;;  %s146_s30 = int_to_ptr.vmem [resolvable:$true] %s145_s30 }
  0x10   : > { %p470_p12 = pneg %p708_p10  ;;  %s531_s4 = scalar_lea.vmem %s146_s30, 16 }
  0x11   : > { %p532_p0 = scmp.ne.s32.totalorder %s146_s30, %s531_s4  ;;  %p539_p5 = scmp.lt.s32.totalorder %s146_s30, %s146_s30 }
  0x12   : > { %p471_p13 = pnand %p712_p11, %p470_p12  ;;  %p540_p6 = scmp.lt.s32.totalorder %s531_s4, %s531_s4 }
  0x14   : > { %p533_p1 = pneg %p471_p13  ;;  %p541_p7 = por %p540_p6, %p539_p5 }
  0x16   : > { %p534_p2 = pnand %p533_p1, %p532_p0 }
  0x18   : > { %p535_p3 = pneg %p534_p2 }
  0x1a   : > { %p542_p9 = pnand %p541_p7, %p535_p3 }
  0x1c   : > { %545 = shalt.err (!%p542_p9)
}
  0x1d   : > { %s630_s5 = smov [#allocation2]   ;;  %174 = sbr.rel (%p708_p10) target bundleno = 290 (0x122), region = 32 }
  0x1e   : > { %473 = dma.vmem_to_smem (!%p471_p13), %s146_s30, 16, %s630_s5, [#allocation4]  }
  0x24   : > { %599 = dma.done.wait (%p712_p11), [#allocation4], 16  }
  0x25   : > { %601 = vsyncadd (%p712_p11), [#allocation4], 4294967280 }
  0x26   : > { %180 = sfence }
  0x27   : > { %p204_p12 = scmp.lt.s32.totalorder %s620_s15, 1  ;;  %v631_v0 = vmov 0.0   ;;  %vm234_vm0 = vcmask 1043456   ;;  %v216_v15 = vld [vmem:[%s795_s2 + $0x8] sm:$0xff]  ;;  %vm227_vm1 = vcmask 293888   ;;  %v215_v16 = vld [vmem:[%s795_s2] sm:$0xff] }
  0x28   : > { %311 = vmatprep.mubr.f32.mxu1 %v631_v0  ;;  %305 = vmatprep.mubr.f32.mxu0 %v631_v0  ;;  %s214_s23 = sld [smem:[#allocation2 + %s620_s15]]  ;;  %s200_s26 = sand.u32 1, %s612_s13  }
  0x29   : > { %s205_s6 = scalar_select %p204_p12, %s620_s15, 1 }
  0x2a   : > { %s437_s27 = sshll.u32 %s200_s26, 4  ;;  %s448_s28 = sshll.u32 %s620_s15, 8 }
  0x2b   : > { %s463_s7 = smul.u32 80, %s205_s6  ;;  %s202_s29 = scalar_lea.vmem [#allocation5], %s437_s27 }
  0x2c   : > { %s342_s30 = sshll.u32 %s202_s29, 4  ;;  %s746_s6 = scalar_lea.hbm %s796_s3, %s448_s28  ;;  %s748_s30 = int_to_ptr.vmem [resolvable:$true] %s342_s30 }
  0x2d   : > { %s211_s10 = scalar_lea.vmem %s794_s1, %s463_s7  ;;  %s326_s7 = scalar_lea.sflag [#allocation3], %s200_s26 }
  0x2e   : > { %v218_v1 = vld [vmem:[%s211_s10 + $0x8] sm:$0xff]  ;;  %v220_v2 = vld [vmem:[%s211_s10 + $0x18] sm:$0xff]  ;;  %v217_v3 = vld [vmem:[%s211_s10] sm:$0xff]  ;;  %v318_v17 = vstv %s214_s23  ;;  %s546_s8 = scalar_lea.vmem %s748_s30, 256  ;;  %s632_s15 = smov [#allocation5]  }
  0x2f   : > { %v449_v4 = vpack.c.bf16 %v220_v2, %v218_v1  ;;  %v219_v5 = vld [vmem:[%s211_s10 + $0x10] sm:$0xff]  ;;  %v222_v6 = vld [vmem:[%s211_s10 + $0x28] sm:$0xff]  ;;  %v224_v7 = vld [vmem:[%s211_s10 + $0x38] sm:$0xff]  ;;  %p547_p10 = scmp.ne.s32.totalorder %s748_s30, %s546_s8  ;;  %s550_s9 = sshll.u32 %s632_s15, 4  ;;  %s551_s9 = int_to_ptr.vmem [resolvable:$false] %s550_s9 }
  0x30   : > { %v451_v8 = vpack.c.bf16 %v219_v5, %v217_v3  ;;  %v453_v9 = vpack.c.bf16 %v224_v7, %v222_v6  ;;  %v221_v10 = vld [vmem:[%s211_s10 + $0x20] sm:$0xff]  ;;  %v223_v11 = vld [vmem:[%s211_s10 + $0x30] sm:$0xff]  ;;  %v226_v13 = vld [vmem:[%s211_s10 + $0x48] sm:$0xf]  ;;  %p553_p0 = scmp.lt.s32.totalorder %s748_s30, %s551_s9 }
  0x31   : > { %457 = vmatprep.subr.bf16.mxu1 %v449_v4  ;;  %450 = vmatprep.subr.bf16.mxu0 %v449_v4  ;;  %v455_v12 = vpack.c.bf16 %v223_v11, %v221_v10  ;;  %v225_v14 = vld [vmem:[%s211_s10 + $0x40] sm:$0xf]  ;;  %p548_p11 = pnand %p547_p10, %p693_p4  ;;  %s552_s10 = scalar_lea.vmem %s551_s9, 512 }
  0x32   : > { %460 = vmatpush1.bf16.msra.mxu1 %v451_v8  ;;  %452 = vmatpush1.bf16.msra.mxu0 %v451_v8  ;;  %p554_p1 = scmp.lt.s32.totalorder %s552_s10, %s546_s8 }
  0x33   : > { %458 = vmatprep.subr.bf16.mxu1 %v453_v9  ;;  %454 = vmatprep.subr.bf16.mxu0 %v453_v9  ;;  %p549_p13 = pneg %p548_p11 }
  0x34   : > { %p555_p2 = por %p554_p1, %p553_p0 }
  0x36   : > { %461 = vmatpush1.bf16.msra.mxu1 %v455_v12  ;;  %456 = vmatpush1.bf16.msra.mxu0 %v455_v12  ;;  %p556_p3 = pnand %p555_p2, %p549_p13 }
  0x37   : > { %459 = vmatprep.subr.msk.mxu1 %vm234_vm0, %v226_v13  ;;  %439 = vmatprep.subr.msk.mxu0 %vm234_vm0, %v226_v13 }
  0x3a   : > { %462 = vmatpush1.msk.msra.mxu1 %vm234_vm0, %v225_v14  ;;  %440 = vmatpush1.msk.msra.mxu0 %vm234_vm0, %v225_v14 }
  0x3b   : > { %442 = vmatmul.mubr.msk.f32.vlgmr.msra.gmra.mrb[0].mxu1 %vm227_vm1, %v216_v15  ;;  %441 = vmatmul.mubr.msk.f32.vlgmr.msra.gmra.mrb[0].mxu0 %vm227_vm1, %v215_v16 }
 0x10e   : > { %v313_v18 = vpop.f32.mrb[0].mxu1  ;;  %v307_v19 = vpop.f32.mrb[0].mxu0 }
 0x10f   : > { %v319_v20 = vmul.f32 %v318_v17, %v313_v18  ;;  %v315_v21 = vpop.f32.mrb[1].mxu1  ;;  %v309_v22 = vpop.f32.mrb[1].mxu0 }
 0x110   : > { %v320_v23 = vmul.f32 %v318_v17, %v315_v21 }
 0x111   : > { %v321_v24 = vadd.f32 %v319_v20, %v307_v19 }
 0x112   : > { %v322_v25 = vadd.f32 %v320_v23, %v309_v22 }
 0x113   : > { %323 = vst [vmem:[%s202_s29] sm:$0xff] %v321_v24 }
 0x114   : > { %324 = vst [vmem:[%s202_s29 + $0x8] sm:$0xff] %v322_v25 }
 0x115   : > { %559 = shalt.err (!%p556_p3)
}
 0x116   : > { %s560_s11 = scalar_lea.hbm %s746_s6, 256  ;;  %s564_s21 = scalar_lea.hbm %s796_s3, 512 }
 0x117   : > { %p561_p5 = scmp.ne.s32.totalorder %s746_s6, %s560_s11  ;;  %p565_p9 = scmp.lt.u32.totalorder %s746_s6, %s796_s3 }
 0x118   : > { %p566_p12 = scmp.lt.u32.totalorder %s564_s21, %s560_s11  ;;  %p568_p11 = scmp.lt.u32.totalorder %s560_s11, %s746_s6 }
 0x119   : > { %p562_p6 = pnand %p561_p5, %p693_p4 }
 0x11a   : > { %p567_p10 = por %p566_p12, %p565_p9 }
 0x11b   : > { %p563_p7 = pneg %p562_p6 }
 0x11c   : > { %p569_p13 = por %p568_p11, %p567_p10 }
 0x11e   : > { %p570_p0 = pnand %p569_p13, %p563_p7 }
 0x120   : > { %573 = shalt.err (!%p570_p0)
}
 0x121   : > { %468 = dma.vmem_to_hbm [thread:$0]  (%p693_p4), %s748_s30, 256, %s746_s6, %s326_s7  }
 0x122 PF: > { %p480_p1 = scmp.ge.s32.totalorder %s628_s17, 2  ;;  %s354_s27 = sand.u32 1, %s608_s12  }
 0x123   : > { %s355_s28 = scalar_lea.sflag [#allocation3], %s354_s27 }
 0x124   : > { %p475_p2 = pnand %p480_p1, %p700_p8 }
 0x126   : > { %603 = dma.done.wait (!%p475_p2), %s355_s28, 256  }
 0x127   : > { %605 = vsyncadd (!%p475_p2), %s355_s28, 4294967040  ;;  %s17_s17 = sadd.s32 1, %s628_s17   ;;  %s801_s12 = smov %s612_s13 }
 0x128   : > { %p14_p3 = scmp.ge.s32.totalorder %s17_s17, 4   ;;  %s802_s13 = smov %s616_s14 }
 0x129   : > { %s803_s14 = smov %s706_s25  ;;  %s804_s15 = smov %s624_s16 }
 0x12a   : > { %s805_s16 = smov %s807_s20  ;;  %16 = sbr.rel (!%p14_p3) target bundleno = 5 (0x5), region = 72 }
 0x131   :  { %360 = vsyncpa [#allocation3], 1 }
 0x132   :  { %362 = vsyncpa [#allocation3 + $0x1], 1 }
 0x133   :  { %363 = vsyncpa [#allocation4], 1 }
 0x134   :  { %365 = vsyncpa [#allocation4 + $0x1], 1 }

</bundles_post_ra>
